<compile_context>
chip_gen: v7x
topology: tpu7x:2x2x1
jax: 0.10.0
libtpu: 0.0.40
codegen_flags: <defaults>
</compile_context>

<pallas_src>
import math
import functools

import jax
import jax.numpy as jnp
from jax.experimental import pallas as pl
from jax.experimental.pallas import tpu as pltpu


def _round_up(x, m):
    return ((x + m - 1) // m) * m


# ------------------------------ Pallas kernels ------------------------------ #
def _nlt_mm_kernel_single_k(w_ref, p_ref, b_ref, o_ref):
    """Single K tile: out = w @ p.T + bias, written directly (no scratch).

    w_ref: (tn, K)     transformed conv weight tile (bf16)
    p_ref: (1, tm, K)  im2col patches tile (bf16)
    b_ref: (tn, 1)     conv bias (f32)
    o_ref: (1, tn, tm) output tile (lane dim = spatial M -> lane-dense store)
    """
    acc = jax.lax.dot_general(
        w_ref[...], p_ref[0],
        dimension_numbers=(((1,), (1,)), ((), ())),   # contract K of both (w @ p.T)
        preferred_element_type=jnp.float32)           # (tn, tm)
    o_ref[0] = (acc + b_ref[...]).astype(o_ref.dtype)


def _nlt_mm_kernel_acc(w_ref, p_ref, b_ref, o_ref, acc_ref):
    """K-tiled fallback with persistent f32 VMEM accumulator (K axis last)."""
    @pl.when(pl.program_id(3) == 0)
    def _():
        acc_ref[...] = jnp.zeros_like(acc_ref)

    acc_ref[...] += jax.lax.dot_general(
        w_ref[...], p_ref[0],
        dimension_numbers=(((1,), (1,)), ((), ())),
        preferred_element_type=jnp.float32)

    @pl.when(pl.program_id(3) == pl.num_programs(3) - 1)
    def _():
        o_ref[0] = (acc_ref[...] + b_ref[...]).astype(o_ref.dtype)


# ------------------------------ matmul wrapper ------------------------------ #
def _nlt_conv_matmul(patches, w_nk, bias_n1, out_dtype, *,
                     tm_pref=1024, tn_cap=512):
    """out[b, n, m] = sum_k w_nk[n, k] * patches[b, m, k] + bias_n1[n, 0].

    patches: (B, M, K) bf16 (M = OH*OW), w_nk: (Nc, K) bf16 (Nc multiple of 8),
    bias_n1: (Nc, 1) f32.  Returns (B, Nc_total, M) in out_dtype.
    """
    B, M, K = patches.shape
    Nc = w_nk.shape[0]
    in_itm = 2
    out_itm = jnp.dtype(out_dtype).itemsize

    # Cout (N) tiling: a single tile when small so the patches stream is read once.
    if Nc <= tn_cap:
        tn = Nc
    else:
        tn = 256
        nc_pad = _round_up(Nc, tn)
        if nc_pad != Nc:                       # tiny arrays, negligible cost
            w_nk = jnp.pad(w_nk, ((0, nc_pad - Nc), (0, 0)))
            bias_n1 = jnp.pad(bias_n1, ((0, nc_pad - Nc), (0, 0)))
            Nc = nc_pad
    num_n = Nc // tn

    # M (spatial) tiling: full image per tile when it fits, else 128-multiples
    # (ragged tail handled by Pallas boundary masking -- no jnp.pad of patches).
    tm = M if M <= tm_pref else tm_pref
    num_m = pl.cdiv(M, tm)
    # Keep >= 2 parallel tiles so both v7x TensorCores get work.
    if B * num_n * num_m == 1 and M >= 256:
        tm = _round_up(pl.cdiv(M, 2), 128)
        num_m = pl.cdiv(M, tm)

    # K tiling: prefer a single full-K tile (no accumulator / zero-init / copy).
    single_k_bytes = 2 * (tm * K + tn * K) * in_itm + 2 * tn * tm * out_itm
    if single_k_bytes <= (28 << 20):
        tk, num_k = K, 1
    else:
        tk = 1024
        k_pad = _round_up(K, tk)
        if k_pad != K:                         # contraction dim must be zero padded
            patches = jnp.pad(patches, ((0, 0), (0, 0), (0, k_pad - K)))
            w_nk = jnp.pad(w_nk, ((0, 0), (0, k_pad - K)))
        num_k = k_pad // tk

    vmem_need = (2 * (tm * tk + tn * tk) * in_itm + 2 * tn * tm * out_itm
                 + 2 * tn * 4 + (tn * tm * 4 if num_k > 1 else 0))
    vmem_limit = int(min(40 << 20, max(2 * vmem_need, 16 << 20)))  # v7x-safe cap

    cost = pl.CostEstimate(
        flops=2 * B * M * K * Nc,
        transcendentals=0,
        bytes_accessed=(B * M * K * in_itm + Nc * K * in_itm + Nc * 4
                        + B * Nc * M * out_itm),
    )

    if num_k == 1:
        return pl.pallas_call(
            _nlt_mm_kernel_single_k,
            out_shape=jax.ShapeDtypeStruct((B, Nc, M), out_dtype),
            grid_spec=pltpu.PrefetchScalarGridSpec(
                num_scalar_prefetch=0,
                grid=(B, num_n, num_m),
                in_specs=[
                    pl.BlockSpec((tn, tk), lambda b, j, i: (j, 0)),       # weight
                    pl.BlockSpec((1, tm, tk), lambda b, j, i: (b, i, 0)),  # patches
                    pl.BlockSpec((tn, 1), lambda b, j, i: (j, 0)),         # bias
                ],
                out_specs=pl.BlockSpec((1, tn, tm), lambda b, j, i: (b, j, i)),
            ),
            compiler_params=pltpu.CompilerParams(
                dimension_semantics=("parallel", "parallel", "parallel"),
                vmem_limit_bytes=vmem_limit),
            cost_estimate=cost,
        )(w_nk, patches, bias_n1)

    return pl.pallas_call(
        _nlt_mm_kernel_acc,
        out_shape=jax.ShapeDtypeStruct((B, Nc, M), out_dtype),
        grid_spec=pltpu.PrefetchScalarGridSpec(
            num_scalar_prefetch=0,
            grid=(B, num_n, num_m, num_k),
            in_specs=[
                pl.BlockSpec((tn, tk), lambda b, j, i, k: (j, k)),
                pl.BlockSpec((1, tm, tk), lambda b, j, i, k: (b, i, k)),
                pl.BlockSpec((tn, 1), lambda b, j, i, k: (j, 0)),
            ],
            out_specs=pl.BlockSpec((1, tn, tm), lambda b, j, i, k: (b, j, i)),
            scratch_shapes=[pltpu.VMEM((tn, tm), jnp.float32)],
        ),
        compiler_params=pltpu.CompilerParams(
            dimension_semantics=("parallel", "parallel", "parallel", "arbitrary"),
            vmem_limit_bytes=vmem_limit),
        cost_estimate=cost,
    )(w_nk, patches, bias_n1)


# ------------------------------ forward wrapper ----------------------------- #
def conv2d_nlt_forward(x, weight, nlt_weight, nlt_bias, bias,
                       stride=(1, 1), padding=(0, 0), dilation=(1, 1),
                       compute_dtype=jnp.bfloat16):
    """x: (B, Cin, H, W) NCHW.  weight: (Cout, Cin, KH, KW) OIHW.
    nlt_weight / nlt_bias: (Cout, Cin, 1, 1).  bias: (Cout,).
    Returns (B, Cout, OH, OW) NCHW in x.dtype."""
    cout, cin, kh, kw = weight.shape
    b = x.shape[0]
    ph, pw = padding
    K = cin * kh * kw

    # NLT weight transform: tiny, grid-invariant -> done once outside the kernel.
    new_weight = weight * nlt_weight + nlt_bias            # broadcast (Cout,Cin,1,1)

    cout_pad = _round_up(cout, 8)
    w_nk = new_weight.reshape(cout, K).astype(compute_dtype)   # K order = (Cin,KH,KW)
    bias_n1 = bias.reshape(cout, 1).astype(jnp.float32)
    if cout_pad != cout:
        w_nk = jnp.pad(w_nk, ((0, cout_pad - cout), (0, 0)))
        bias_n1 = jnp.pad(bias_n1, ((0, cout_pad - cout), (0, 0)))

    # im2col in one fused XLA op, AFTER casting x to the compute dtype so the
    # patches are written to HBM once, already in bf16.  NHWC output spec makes
    # the reshape to (B, OH*OW, K) free; feature ordering is (Cin, KH, KW),
    # which matches the OIHW flatten of the weight (checked in __main__).
    patches = jax.lax.conv_general_dilated_patches(
        x.astype(compute_dtype), filter_shape=(kh, kw), window_strides=stride,
        padding=[(ph, ph), (pw, pw)], rhs_dilation=dilation,
        dimension_numbers=("NCHW", "OIHW", "NHWC"))            # (B, OH, OW, K)
    _, oh, ow, _ = patches.shape
    patches = patches.reshape(b, oh * ow, K)

    out = _nlt_conv_matmul(patches, w_nk, bias_n1, x.dtype)    # (B, >=cout_pad, OH*OW)
    if out.shape[1] != cout:
        out = out[:, :cout]
    return out.reshape(b, cout, oh, ow)                        # NCHW, no transpose


# ------------------------------ parameter init ------------------------------ #
def init_conv2d_nlt_params(key, in_channels, out_channels, kernel_size,
                           bias=True, dtype=jnp.float32):
    kh, kw = kernel_size
    n = in_channels * kh * kw
    stdv = 1.0 / math.sqrt(n)
    k_w, k_b = jax.random.split(key)
    weight = jax.random.uniform(k_w, (out_channels, in_channels, kh, kw),
                                minval=-stdv, maxval=stdv, dtype=dtype)
    nlt_weight = jnp.ones((out_channels, in_channels, 1, 1), dtype)   # uniform_(1,1)
    nlt_bias = jnp.zeros((out_channels, in_channels, 1, 1), dtype)    # uniform_(0,0)
    if bias:
        b = jax.random.uniform(k_b, (out_channels,),
                               minval=-stdv, maxval=stdv, dtype=dtype)
    else:
        b = jnp.zeros((out_channels,), dtype)
    return weight, nlt_weight, nlt_bias, b


# ---------------------------------- main ------------------------------------ #
if __name__ == "__main__":
    key = jax.random.PRNGKey(0)
    k_x, k_p = jax.random.split(key)

    # Small Conv2d_nlt(4, 8, kernel_size=3, stride=1, padding=1, bias=True)
    N, Cin, H, W = 2, 4, 16, 16
    Cout, KH, KW = 8, 3, 3
    stride, padding, dilation = (1, 1), (1, 1), (1, 1)

    x = jax.random.normal(k_x, (N, Cin, H, W), jnp.float32)
    weight, nlt_w, nlt_b, bias = init_conv2d_nlt_params(
        k_p, Cin, Cout, (KH, KW), bias=True)

    fwd = jax.jit(functools.partial(
        conv2d_nlt_forward, stride=stride, padding=padding, dilation=dilation))
    out = fwd(x, weight, nlt_w, nlt_b, bias)
    jax.block_until_ready(out)

    # Reference check against XLA's conv (f32).
    new_weight = weight * jnp.broadcast_to(nlt_w, weight.shape) \
                 + jnp.broadcast_to(nlt_b, weight.shape)
    ref = jax.lax.conv_general_dilated(
        x, new_weight, window_strides=stride, padding=[padding, padding],
        rhs_dilation=dilation,
        dimension_numbers=("NCHW", "OIHW", "NCHW"))
    ref = ref + bias.reshape(1, Cout, 1, 1)
    assert out.shape == (N, Cout, H, W), out.shape
    err = float(jnp.max(jnp.abs(out - ref)))
    # bf16 MXU inputs with f32 accumulation -> relaxed tolerance vs f32 ref.
    assert jnp.allclose(out, ref, atol=3e-2, rtol=3e-2), err

    print("KERNEL_OK")
</pallas_src>

<mosaic_0001>
module attributes {stable_mosaic.version = 11 : i64} {
  func.func @_nlt_mm_kernel_single_k(%arg0: i32, %arg1: i32, %arg2: i32, %arg3: memref<8x36xbf16, #tpu.memory_space<vmem>>, %arg4: memref<1x256x36xbf16, #tpu.memory_space<vmem>>, %arg5: memref<8x1xf32, #tpu.memory_space<vmem>>, %arg6: memref<1x8x256xf32, #tpu.memory_space<vmem>>) attributes {dimension_semantics = [#tpu.dimension_semantics<parallel>, #tpu.dimension_semantics<parallel>, #tpu.dimension_semantics<parallel>], iteration_bounds = array<i64: 2, 1, 1>, scalar_prefetch = 0 : i64, scratch_operands = 0 : i64, tpu.core_type = #tpu.core_type<tc>, window_params = [{transform_indices = @transform_0, window_bounds = array<i64: 8, 36>}, {transform_indices = @transform_1, window_bounds = array<i64: 1, 256, 36>}, {transform_indices = @transform_2, window_bounds = array<i64: 8, 1>}, {transform_indices = @transform_3, window_bounds = array<i64: 1, 8, 256>}]} {
    %c0 = arith.constant 0 : index
    %c0_0 = arith.constant 0 : index
    %0 = vector.load %arg3[%c0, %c0_0] : memref<8x36xbf16, #tpu.memory_space<vmem>>, vector<8x36xbf16>
    %c0_1 = arith.constant 0 : index
    %c0_2 = arith.constant 0 : index
    %c0_3 = arith.constant 0 : index
    %1 = vector.load %arg4[%c0_1, %c0_2, %c0_3] : memref<1x256x36xbf16, #tpu.memory_space<vmem>>, vector<1x256x36xbf16>
    %2 = vector.shape_cast %1 : vector<1x256x36xbf16> to vector<256x36xbf16>
    %cst = arith.constant dense<0.000000e+00> : vector<8x256xf32>
    %3 = tpu.matmul %0, %2, %cst {dimension_numbers = #tpu.dot_dimension_numbers<[1], [1], [0], [0], [0, 0, 1, 0], [], []>} : vector<8x36xbf16>, vector<256x36xbf16>, vector<8x256xf32> -> vector<8x256xf32>
    %c0_4 = arith.constant 0 : index
    %c0_5 = arith.constant 0 : index
    %4 = vector.load %arg5[%c0_4, %c0_5] : memref<8x1xf32, #tpu.memory_space<vmem>>, vector<8x1xf32>
    %5 = vector.broadcast %4 : vector<8x1xf32> to vector<8x256xf32>
    %6 = arith.addf %3, %5 : vector<8x256xf32>
    %c0_6 = arith.constant 0 : index
    %c0_7 = arith.constant 0 : index
    %c0_8 = arith.constant 0 : index
    %7 = vector.load %arg6[%c0_6, %c0_7, %c0_8] : memref<1x8x256xf32, #tpu.memory_space<vmem>>, vector<1x8x256xf32>
    %8 = vector.shape_cast %7 : vector<1x8x256xf32> to vector<8x256xf32>
    %9 = vector.shape_cast %6 : vector<8x256xf32> to vector<1x8x256xf32>
    tpu.vector_store %arg6[%c0_6, %c0_7, %c0_8], %9 {strides = array<i32>} : memref<1x8x256xf32, #tpu.memory_space<vmem>>, vector<1x8x256xf32>,
    return
  }
  func.func @transform_0(%arg0: i32, %arg1: i32, %arg2: i32) -> (i32, i32) {
    %c0_i32 = arith.constant 0 : i32
    %c0_i32_0 = arith.constant 0 : i32
    return %arg1, %c0_i32 : i32, i32
  }
  func.func @transform_1(%arg0: i32, %arg1: i32, %arg2: i32) -> (i32, i32, i32) {
    %c0_i32 = arith.constant 0 : i32
    %c0_i32_0 = arith.constant 0 : i32
    return %arg0, %arg2, %c0_i32 : i32, i32, i32
  }
  func.func @transform_2(%arg0: i32, %arg1: i32, %arg2: i32) -> (i32, i32) {
    %c0_i32 = arith.constant 0 : i32
    %c0_i32_0 = arith.constant 0 : i32
    return %arg1, %c0_i32 : i32, i32
  }
  func.func @transform_3(%arg0: i32, %arg1: i32, %arg2: i32) -> (i32, i32, i32) {
    %c0_i32 = arith.constant 0 : i32
    return %arg0, %arg1, %arg2 : i32, i32, i32
  }
}

</mosaic_0001>

<bundles_post_ra>
// kernel: conv2d_nlt_forward.1
= control target key start
LH: loop header
LB: loop body
LE: loop exit
PB: predicated region body
PF: predicated region fallthrough
CT: control target
= control target key end

     0   :  { %s757_s12 = smov 0   ;;  %s759_s13 = smov 0   ;;  %s836_s0 = inlined_call_operand.vmem [shape: bf16[8,36], index: 0, kind: input, shape index: {}]   ;;  %s837_s1 = inlined_call_operand.vmem [shape: bf16[2,256,36], index: 1, kind: input, shape index: {}]   ;;  %s838_s2 = inlined_call_operand.vmem [shape: f32[8,1], index: 2, kind: input, shape index: {}]   ;;  %s839_s3 = inlined_call_operand.vmem [shape: f32[2,8,256], index: 3, kind: output, shape index: {}]  }
   0x1   :  { %s761_s14 = smov 0  }
   0x2 LB: > { %s32_s15 = sadd.s32 1, %s730_s13  ;;  %p618_p0 = scmp.ge.s32.totalorder %s734_s14, 1  ;;  %s734_s14 = sphi %s761_s14, %s13_s14   ;;  %s730_s13 = sphi %s759_s13, %s841_s13   ;;  %s726_s12 = sphi %s757_s12, %s840_s12  }
   0x3   : > { %p34_p1 = scmp.ge.s32.totalorder %s32_s15, 2  ;;  %p185_p2 = scmp.lt.s32.totalorder %s734_s14, 3 }
   0x5   : > { %s843_s15 = smov (%p34_p1, %s32_s15), 0  ;;  %p186_p3 = pnand %p618_p0, %p185_p2 }
   0x6   : > { %p234_p4 = scmp.lt.s32.totalorder (!%p186_p3), %s726_s12, 1  ;;  %vm381_vm0 = vcmask (!%p186_p3), 293888   ;;  %v262_v0 = vld [vmem:[%s836_s0] sm:$0xf] (!%p186_p3)  ;;  %v736_v2 = vmov (!%p186_p3), 0  }
   0x7   : > { %189 = sbr.rel (%p186_p3) target bundleno = 299 (0x12b), region = 32  ;;  %v295_v1 = vld [vmem:[%s838_s2] sm:$0xff] (!%p186_p3)  ;;  %660 = vmatprep.mubr.msk.bf16.mxu0 (!%p186_p3), %vm381_vm0, %v262_v0  ;;  %695 = vset.pattern.permute.xlu0 (!%p186_p3), %v736_v2 }
   0x8   : > { %298 = vperm.xlu0 (!%p186_p3), %695, %v295_v1  }
   0xe   : > { %s845_s12 = smov (!%p234_p4, %s726_s12), 1 }
   0xf   : > { %s642_s20 = sshll.u32 %s845_s12, 7  ;;  %s643_s24 = sshll.u32 %s845_s12, 4 }
  0x10   : > { %s788_s23 = scalar_lea.vmem %s837_s1, %s642_s20  ;;  %s259_s27 = scalar_lea.vmem %s839_s3, %s643_s24 }
  0x11   : > { %v696_v3 = vld [vmem:[%s788_s23 + $0x40] sm:$0xff]   ;;  %v698_v5 = vld [vmem:[%s788_s23 + $0x48] sm:$0xff]   ;;  %v700_v9 = vld [vmem:[%s788_s23 + $0x50] sm:$0xff]  }
  0x12   : > { %v697_v4 = vld [vmem:[%s788_s23] sm:$0xff]   ;;  %662 = vmatprep.subr.msk.bf16.mxu0 %vm381_vm0, %v696_v3  ;;  %v699_v7 = vld [vmem:[%s788_s23 + $0x8] sm:$0xff]   ;;  %v701_v10 = vld [vmem:[%s788_s23 + $0x10] sm:$0xff]  }
  0x13   : > { %v386_v6 = vsel %vm381_vm0, %v697_v4, 0  ;;  %v389_v8 = vsel %vm381_vm0, %v699_v7, 0  ;;  %v392_v11 = vsel %vm381_vm0, %v701_v10, 0  ;;  %v702_v12 = vld [vmem:[%s788_s23 + $0x58] sm:$0xff]   ;;  %v704_v15 = vld [vmem:[%s788_s23 + $0x60] sm:$0xff]   ;;  %v706_v18 = vld [vmem:[%s788_s23 + $0x68] sm:$0xff]  }
  0x14   : > { %645 = vmatpush3.bf16.xpose.msra.mxu0 %v386_v6  ;;  %v703_v13 = vld [vmem:[%s788_s23 + $0x18] sm:$0xff]   ;;  %v705_v16 = vld [vmem:[%s788_s23 + $0x20] sm:$0xff]   ;;  %v707_v19 = vld [vmem:[%s788_s23 + $0x28] sm:$0xff]  }
  0x15   : > { %663 = vmatprep.subr.msk.bf16.mxu0 %vm381_vm0, %v698_v5  ;;  %v395_v14 = vsel %vm381_vm0, %v703_v13, 0  ;;  %v398_v17 = vsel %vm381_vm0, %v705_v16, 0  ;;  %v401_v20 = vsel %vm381_vm0, %v707_v19, 0  ;;  %v708_v21 = vld [vmem:[%s788_s23 + $0x70] sm:$0xff]   ;;  %v710_v24 = vld [vmem:[%s788_s23 + $0x78] sm:$0xff]  }
  0x16   : > { %v709_v22 = vld [vmem:[%s788_s23 + $0x30] sm:$0xff]   ;;  %v711_v25 = vld [vmem:[%s788_s23 + $0x38] sm:$0xff]  }
  0x17   : > { %v404_v23 = vsel %vm381_vm0, %v709_v22, 0  ;;  %v407_v26 = vsel %vm381_vm0, %v711_v25, 0 }
  0x1c   : > { %647 = vmatpush3.bf16.xpose.msra.mxu0 %v389_v8 }
  0x1d   : > { %664 = vmatprep.subr.msk.bf16.mxu0 %vm381_vm0, %v700_v9 }
  0x24   : > { %649 = vmatpush3.bf16.xpose.msra.mxu0 %v392_v11 }
  0x25   : > { %665 = vmatprep.subr.msk.bf16.mxu0 %vm381_vm0, %v702_v12 }
  0x2c   : > { %651 = vmatpush3.bf16.xpose.msra.mxu0 %v395_v14 }
  0x2d   : > { %666 = vmatprep.subr.msk.bf16.mxu0 %vm381_vm0, %v704_v15 }
  0x34   : > { %653 = vmatpush3.bf16.xpose.msra.mxu0 %v398_v17 }
  0x35   : > { %667 = vmatprep.subr.msk.bf16.mxu0 %vm381_vm0, %v706_v18 }
  0x3c   : > { %655 = vmatpush3.bf16.xpose.msra.mxu0 %v401_v20 }
  0x3d   : > { %668 = vmatprep.subr.msk.bf16.mxu0 %vm381_vm0, %v708_v21 }
  0x44   : > { %657 = vmatpush3.bf16.xpose.msra.mxu0 %v404_v23 }
  0x45   : > { %669 = vmatprep.subr.msk.bf16.mxu0 %vm381_vm0, %v710_v24 }
  0x4c   : > { %659 = vmatpush3.bf16.xpose.msra.mxu0 %v407_v26 }
  0x53   : > { %661 = vmatmul.mubr.msk.bf16.vlgmr.msra.gmra.mrb[0].mxu0 %vm381_vm0, %v262_v0 }
  0x87   : > { %v299_v27 = vpop.permute.xlu0 %298 }
 0x126   : > { %v467_v28 = vpop.f32.mrb[0].mxu0 }
 0x127   : > { %v468_v29 = vadd.f32 %v467_v28, %v299_v27  ;;  %v469_v30 = vpop.f32.mrb[1].mxu0 }
 0x128   : > { %v470_v31 = vadd.f32 %v469_v30, %v299_v27  ;;  %v471_v32 = vpop.f32.mrb[2].mxu0 }
 0x129   : > { %474 = vst [vmem:[%s259_s27] sm:$0xff] %v468_v29  ;;  %v472_v33 = vpop.f32.mrb[3].mxu0 }
 0x12a   : > { %475 = vst [vmem:[%s259_s27 + $0x8] sm:$0xff] %v470_v31 }
 0x12b PF: > { %s13_s14 = sadd.s32 1, %s734_s14   ;;  %s840_s12 = smov %s730_s13 }
 0x12c   : > { %p10_p5 = scmp.ge.s32.totalorder %s13_s14, 4   ;;  %s841_s13 = smov %s843_s15 }
 0x12e   :  { %12 = sbr.rel (!%p10_p5) target bundleno = 2 (0x2), region = 68 }

</bundles_post_ra>
